<compile_context>
chip_gen: v5e
topology: v5e:2x2
jax: 0.10.0
libtpu: 0.0.40
codegen_flags: <defaults>
</compile_context>

<pallas_src>
import functools
import math

import jax
import jax.numpy as jnp
from jax.experimental import pallas as pl
from jax.experimental.pallas import tpu as pltpu

# Network architecture: 1 -> hidden -> ... -> 1 (same spirit as the PINN).
LAYERS = [1, 32, 32, 1]
TM_MAX = 8192  # max batch tile on the lane axis (multiple of 128)


def pack_params(weights, biases):
    """Pack all layer params into one (rows, cols) f32 buffer (feature-major).

    weights[l]: (in_l, out_l), biases[l]: (1, out_l)   (PyTorch-equivalent init)

    Column layout:
      [middle-layer W^T (out,in) | b] ... , then [layer-0 w | b], then
      [last-layer w (as a column) | b].  Middle-layer weights go first so the
      MXU operand starts at lane offset 0.

    Call ONCE per parameter update (not per forward); returns the packed
    buffer plus static layer dims / per-layer column offsets.
    """
    L = len(weights)
    layer_dims = [w.shape[0] for w in weights] + [weights[-1].shape[1]]
    assert layer_dims[0] == 1 and layer_dims[-1] == 1, "PINN is 1D in/out"
    hidden = layer_dims[1:-1]
    rows = max(hidden)
    rows_p = ((rows + 7) // 8) * 8

    cols = sum(weights[l].shape[0] + 1 for l in range(1, L - 1)) + 2 + 2
    cols_p = ((cols + 127) // 128) * 128

    P = jnp.zeros((rows_p, cols_p), jnp.float32)
    offsets = [0] * L
    c = 0
    # Middle layers: W stored feature-major (out, in), bias as one column.
    for l in range(1, L - 1):
        in_l, out_l = weights[l].shape
        P = P.at[:out_l, c:c + in_l].set(weights[l].T)
        P = P.at[:out_l, c + in_l].set(biases[l][0, :])
        offsets[l] = c
        c += in_l + 1
    # Layer 0 (in_features = 1): weight and bias as columns.
    out0 = weights[0].shape[1]
    P = P.at[:out0, c].set(weights[0][0, :])
    P = P.at[:out0, c + 1].set(biases[0][0, :])
    offsets[0] = c
    c += 2
    # Last layer (out_features = 1): weight as a column, bias as a (1,1) cell.
    in_L = weights[-1].shape[0]
    P = P.at[:in_L, c].set(weights[-1][:, 0])
    P = P.at[0, c + 1].set(biases[-1][0, 0])
    offsets[L - 1] = c
    return P, tuple(layer_dims), tuple(offsets)


def make_mlp_kernel(layer_dims, offsets, use_bf16_matmul=False):
    """Kernel closure over static layer sizes / packed-param column offsets."""
    L = len(layer_dims) - 1

    def mlp_kernel(p_ref, x_ref, o_ref):
        x = x_ref[...]                          # (1, TM) — batch on lanes

        # Layer 0 (K=1): VPU broadcast multiply-add (outer product), no MXU.
        c0 = offsets[0]
        out0 = layer_dims[1]
        w0 = p_ref[:out0, c0:c0 + 1]            # narrow VMEM load, (H0, 1)
        b0 = p_ref[:out0, c0 + 1:c0 + 2]        # (H0, 1)
        h = jnp.tanh(w0 * x + b0)               # (H0, TM)

        # Middle layers: (out, in) @ (in, TM) on the MXU.
        for l in range(1, L - 1):
            c = offsets[l]
            in_l, out_l = layer_dims[l], layer_dims[l + 1]
            w = p_ref[:out_l, c:c + in_l]                       # (out, in)
            b = p_ref[:out_l, c + in_l:c + in_l + 1]            # (out, 1)
            if use_bf16_matmul:
                z = jnp.dot(w.astype(jnp.bfloat16), h.astype(jnp.bfloat16),
                            preferred_element_type=jnp.float32)
            else:
                z = jnp.dot(w, h, preferred_element_type=jnp.float32)
            h = jnp.tanh(z + b)

        # Last layer (H -> 1): VPU multiply + cross-sublane (XLU) reduce.
        cL = offsets[L - 1]
        in_L = layer_dims[L - 1]
        w_last = p_ref[:in_L, cL:cL + 1]        # (H, 1)
        b_last = p_ref[0:1, cL + 1:cL + 2]      # (1, 1)
        out = jnp.sum(w_last * h, axis=0, keepdims=True) + b_last
        o_ref[...] = out.astype(o_ref.dtype)    # (1, TM), lane-dense unmasked store

    return mlp_kernel


def _device_min_grid():
    """>=2 grid steps only where there are 2 TensorCores to feed (v7x)."""
    try:
        kind = jax.devices()[0].device_kind.lower()
        if "v7" in kind:
            return 2
    except Exception:
        pass
    return 1  # v5e / v6e: single TC -> a second grid step is pure overhead


def _choose_tiling(n, tm_max):
    """Pad batch to a multiple of 128 and pick a fat lane tile."""
    n_pad = ((max(n, 1) + 127) // 128) * 128
    min_steps = _device_min_grid()
    tm = min(tm_max, -(-n_pad // min_steps))
    tm = ((tm + 127) // 128) * 128
    n_pad = ((n_pad + tm - 1) // tm) * tm
    return n_pad, tm


def gpe_pinn_forward(x, packed_params, layer_dims, offsets, *,
                     tm_max=TM_MAX, use_bf16_matmul=False):
    """Forward pass of the PINN MLP. x: (N, 1) -> (N, 1).

    `packed_params` / `layer_dims` / `offsets` come from pack_params (called
    once per parameter update, not per forward).
    """
    N = x.shape[0]
    n_pad, tm = _choose_tiling(N, tm_max)
    grid = (n_pad // tm,)

    # Feature-major: batch on the 128-lane axis; pad so every tile is full
    # (unmasked stores, full-width DMAs).  Padded lanes are dropped below.
    x_lane = jnp.pad(x.astype(jnp.float32).reshape(1, N),
                     ((0, 0), (0, n_pad - N)))

    kernel = make_mlp_kernel(layer_dims, offsets, use_bf16_matmul)

    flops = 2 * n_pad * sum(layer_dims[i] * layer_dims[i + 1]
                            for i in range(len(layer_dims) - 1))
    transcendentals = n_pad * sum(layer_dims[1:-1])
    bytes_accessed = 4 * (n_pad * layer_dims[0] + n_pad * layer_dims[-1]
                          + packed_params.size)

    out = pl.pallas_call(
        kernel,
        out_shape=jax.ShapeDtypeStruct((1, n_pad), jnp.float32),
        grid_spec=pltpu.PrefetchScalarGridSpec(
            num_scalar_prefetch=0,
            grid=grid,
            in_specs=[
                # Packed params: full-extent block, constant index => one DMA,
                # VMEM-resident across all grid steps.
                pl.BlockSpec(packed_params.shape, lambda i: (0, 0)),
                # Input tile: (1, tm), lane-dense.
                pl.BlockSpec((1, tm), lambda i: (0, i)),
            ],
            out_specs=pl.BlockSpec((1, tm), lambda i: (0, i)),
        ),
        compiler_params=pltpu.CompilerParams(
            dimension_semantics=("parallel",)),
        cost_estimate=pl.CostEstimate(
            flops=flops,
            transcendentals=transcendentals,
            bytes_accessed=bytes_accessed),
    )(packed_params, x_lane)
    return out[0, :N].reshape(N, 1)


def init_params(layers, key):
    """Deterministic init mimicking nn.Linear default: U(-k, k), k=1/sqrt(fan_in)."""
    weights, biases = [], []
    for i in range(len(layers) - 1):
        fan_in, fan_out = layers[i], layers[i + 1]
        k = 1.0 / math.sqrt(fan_in)
        key, kw, kb = jax.random.split(key, 3)
        w = jax.random.uniform(kw, (fan_in, fan_out), jnp.float32, -k, k)
        b = jax.random.uniform(kb, (1, fan_out), jnp.float32, -k, k)
        weights.append(w)
        biases.append(b)
    return weights, biases


def reference_forward(x, weights, biases):
    h = x
    for i, (w, b) in enumerate(zip(weights, biases)):
        h = h @ w + b
        if i < len(weights) - 1:
            h = jnp.tanh(h)
    return h


if __name__ == "__main__":
    key = jax.random.PRNGKey(0)
    key, kx = jax.random.split(key)

    # Collocation points; intentionally NOT a multiple of 128 to exercise the
    # wrapper-side pad-to-lane-dense path.
    N = 1000
    x = jax.random.uniform(kx, (N, LAYERS[0]), jnp.float32, -5.0, 5.0)

    weights, biases = init_params(LAYERS, key)

    # Pack parameters ONCE (per parameter update), outside the forward path.
    P, layer_dims, offsets = pack_params(weights, biases)

    fwd = jax.jit(functools.partial(gpe_pinn_forward,
                                    layer_dims=layer_dims,
                                    offsets=offsets))
    out = jax.block_until_ready(fwd(x, P))

    ref = reference_forward(x, weights, biases)
    assert out.shape == (N, LAYERS[-1])
    assert jnp.allclose(out, ref, atol=1e-5, rtol=1e-5), "mismatch vs reference"

    # TODO(synk): riesz_loss / pde_residual / boundary_loss / symmetry_loss need
    # autograd (u_x, u_xx, parameter grads) through the kernel; pallas_call has
    # no autodiff rule, so training use requires a custom_vjp (or in-kernel
    # analytic derivatives).  weighted_hermite uses scipy's hermite (host-side).
    print("KERNEL_OK")
</pallas_src>

<mosaic_0001>
module attributes {stable_mosaic.version = 11 : i64} {
  func.func @mlp_kernel(%arg0: i32, %arg1: memref<32x128xf32, #tpu.memory_space<vmem>>, %arg2: memref<1x1024xf32, #tpu.memory_space<vmem>>, %arg3: memref<1x1024xf32, #tpu.memory_space<vmem>>) attributes {dimension_semantics = [#tpu.dimension_semantics<parallel>], iteration_bounds = array<i64: 1>, scalar_prefetch = 0 : i64, scratch_operands = 0 : i64, tpu.core_type = #tpu.core_type<tc>, window_params = [{pipeline_mode = #tpu.pipeline_mode<synchronous>, transform_indices = @transform_0, window_bounds = array<i64: 32, 128>}, {transform_indices = @transform_1, window_bounds = array<i64: 1, 1024>}, {transform_indices = @transform_2, window_bounds = array<i64: 1, 1024>}]} {
    %c0 = arith.constant 0 : index
    %c0_0 = arith.constant 0 : index
    %0 = vector.load %arg2[%c0, %c0_0] : memref<1x1024xf32, #tpu.memory_space<vmem>>, vector<1x1024xf32>
    %c0_1 = arith.constant 0 : index
    %c33 = arith.constant 33 : index
    %1 = vector.load %arg1[%c0_1, %c33] : memref<32x128xf32, #tpu.memory_space<vmem>>, vector<32x1xf32>
    %c0_2 = arith.constant 0 : index
    %c34 = arith.constant 34 : index
    %2 = vector.load %arg1[%c0_2, %c34] : memref<32x128xf32, #tpu.memory_space<vmem>>, vector<32x1xf32>
    %3 = vector.broadcast %1 : vector<32x1xf32> to vector<32x1024xf32>
    %4 = vector.broadcast %0 : vector<1x1024xf32> to vector<32x1024xf32>
    %5 = arith.mulf %3, %4 : vector<32x1024xf32>
    %6 = vector.broadcast %2 : vector<32x1xf32> to vector<32x1024xf32>
    %7 = arith.addf %5, %6 : vector<32x1024xf32>
    %8 = math.tanh %7 : vector<32x1024xf32>
    %c0_3 = arith.constant 0 : index
    %c0_4 = arith.constant 0 : index
    %9 = vector.load %arg1[%c0_3, %c0_4] : memref<32x128xf32, #tpu.memory_space<vmem>>, vector<32x32xf32>
    %c0_5 = arith.constant 0 : index
    %c32 = arith.constant 32 : index
    %10 = vector.load %arg1[%c0_5, %c32] : memref<32x128xf32, #tpu.memory_space<vmem>>, vector<32x1xf32>
    %cst = arith.constant dense<0.000000e+00> : vector<32x1024xf32>
    %11 = tpu.matmul %9, %8, %cst {dimension_numbers = #tpu.dot_dimension_numbers<[1], [0], [0], [1], [0, 0, 1, 1], [], []>} : vector<32x32xf32>, vector<32x1024xf32>, vector<32x1024xf32> -> vector<32x1024xf32>
    %12 = vector.broadcast %10 : vector<32x1xf32> to vector<32x1024xf32>
    %13 = arith.addf %11, %12 : vector<32x1024xf32>
    %14 = math.tanh %13 : vector<32x1024xf32>
    %c0_6 = arith.constant 0 : index
    %c35 = arith.constant 35 : index
    %15 = vector.load %arg1[%c0_6, %c35] : memref<32x128xf32, #tpu.memory_space<vmem>>, vector<32x1xf32>
    %c0_7 = arith.constant 0 : index
    %c36 = arith.constant 36 : index
    %16 = vector.load %arg1[%c0_7, %c36] : memref<32x128xf32, #tpu.memory_space<vmem>>, vector<1x1xf32>
    %17 = vector.broadcast %15 : vector<32x1xf32> to vector<32x1024xf32>
    %18 = arith.mulf %17, %14 : vector<32x1024xf32>
    %cst_8 = arith.constant dense<0.000000e+00> : vector<1024xf32>
    %19 = vector.multi_reduction <add>, %18, %cst_8 [0] : vector<32x1024xf32> to vector<1024xf32>
    %20 = vector.shape_cast %19 : vector<1024xf32> to vector<1x1024xf32>
    %21 = vector.broadcast %16 : vector<1x1xf32> to vector<1x1024xf32>
    %22 = arith.addf %20, %21 : vector<1x1024xf32>
    %c0_9 = arith.constant 0 : index
    %c0_10 = arith.constant 0 : index
    %23 = vector.load %arg3[%c0_9, %c0_10] : memref<1x1024xf32, #tpu.memory_space<vmem>>, vector<1x1024xf32>
    tpu.vector_store %arg3[%c0_9, %c0_10], %22 {strides = array<i32>} : memref<1x1024xf32, #tpu.memory_space<vmem>>, vector<1x1024xf32>,
    return
  }
  func.func @transform_0(%arg0: i32) -> (i32, i32) {
    %c0_i32 = arith.constant 0 : i32
    %c0_i32_0 = arith.constant 0 : i32
    %c0_i32_1 = arith.constant 0 : i32
    return %c0_i32, %c0_i32_0 : i32, i32
  }
  func.func @transform_1(%arg0: i32) -> (i32, i32) {
    %c0_i32 = arith.constant 0 : i32
    %c0_i32_0 = arith.constant 0 : i32
    return %c0_i32, %arg0 : i32, i32
  }
  func.func @transform_2(%arg0: i32) -> (i32, i32) {
    %c0_i32 = arith.constant 0 : i32
    %c0_i32_0 = arith.constant 0 : i32
    return %c0_i32, %arg0 : i32, i32
  }
}

</mosaic_0001>

<bundles_post_ra>
// kernel: gpe_pinn_forward.1
= control target key start
LH: loop header
LB: loop body
LE: loop exit
PB: predicated region body
PF: predicated region fallthrough
CT: control target
= control target key end

     0   :  { %7 = vsyncpa [#allocation3], 0  ;;  %s847_s12 = smov [#allocation2]   ;;  %s848_s14 = smov 128   ;;  %s1158_s0 = inlined_call_operand.hbm [shape: f32[32,128], index: 0, kind: input, shape index: {}]   ;;  %s1159_s1 = inlined_call_operand.vmem [shape: f32[1,1024], index: 1, kind: input, shape index: {}]   ;;  %s1160_s2 = inlined_call_operand.vmem [shape: f32[1,1024], index: 2, kind: output, shape index: {}]  }
   0x1   :  { %s12_s11 = sshll.u32 %s1158_s0, 4  ;;  %s14_s13 = sshll.u32 %s847_s12, 4  ;;  %s13_s11 = int_to_ptr.hbm [resolvable:$true] %s12_s11  ;;  %s15_s13 = int_to_ptr.vmem [resolvable:$true] %s14_s13 }
   0x2   :  { %s849_s15 = smov 8  }
   0x3   :  { %20 = dma.hbm_to_vmem [thread:$0]  %s13_s11, 512, %s15_s13, [#allocation3], %s848_s14, %s848_s14, %s849_s15  }
   0x4   :  { %845 = dma.done.wait [#allocation3], 512  }
   0x5   :  { %846 = vsyncadd [#allocation3], 4294966784  ;;  %v850_v0 = vmov 33   ;;  %v851_v1 = vmov 34   ;;  %v873_v2 = vld [vmem:[#allocation2 + $0x18] sm:$0xff]  ;;  %v877_v3 = vld [vmem:[#allocation2 + $0x10] sm:$0xff] }
   0x6   :  { %680 = vset.pattern.permute.xlu0 %v850_v0  ;;  %681 = vset.pattern.permute.xlu1 %v851_v1  ;;  %v880_v4 = vld [vmem:[#allocation2 + $0x8] sm:$0xff]  ;;  %v884_v5 = vld [vmem:[#allocation2] sm:$0xff]  ;;  %v852_v57 = vmov 32   ;;  %vm197_vm0 = vcmask 261120   ;;  %vm619_vm1 = vcmask 1040384   ;;  %vm621_vm2 = vcmask 1042434  }
   0x7   :  { %683 = vset.pattern.permute.xlu2 %v851_v1  ;;  %49 = vperm.xlu0 %680, %v873_v2   ;;  %v27_v6 = vld [vmem:[%s1159_s1] sm:$0xff]  ;;  %vm623_vm3 = vcmask 1041408   ;;  %vm625_vm4 = vcmask 1044484   ;;  %vm627_vm5 = vcmask 1046534   ;;  %vm629_vm6 = vcmask 1045508  }
   0x8   :  { %114 = vperm.xlu1 %681, %v873_v2   ;;  %110 = vperm.xlu2 %683, %v877_v3   ;;  %v53_v7 = vperm.slane %v27_v6, 0  ;;  %v54_v8 = vperm.slane %v27_v6, 1  ;;  %v55_v9 = vperm.slane %v27_v6, 2  ;;  %v892_v10 = vperm.slane %v27_v6, 3 }
   0x9   :  { %v909_v22 = vperm.slane %v27_v6, 4  ;;  %v911_v23 = vperm.slane %v27_v6, 5  ;;  %v933_v42 = vperm.slane %v27_v6, 6  ;;  %v946_v52 = vperm.slane %v27_v6, 7 }
   0xa   :  { %vm631_vm7 = vcmask 1043456  }
   0xf   :  { %44 = vperm.xlu0 %680, %v877_v3  }
  0x10   :  { %682 = vset.pattern.permute.xlu1 %v850_v0  ;;  %684 = vset.pattern.permute.xlu2 %v850_v0 }
  0x11   :  { %39 = vperm.xlu1 %682, %v880_v4   ;;  %34 = vperm.xlu2 %684, %v884_v5  }
  0x17   :  { %685 = vset.pattern.permute.xlu0 %v851_v1 }
  0x18   :  { %106 = vperm.xlu0 %685, %v880_v4  }
  0x19   :  { %686 = vset.pattern.permute.xlu1 %v851_v1  ;;  %687 = vset.pattern.permute.xlu2 %v852_v57 }
  0x1a   :  { %102 = vperm.xlu1 %686, %v884_v5   ;;  %182 = vperm.xlu2 %687, %v884_v5  }
  0x20   :  { %689 = vset.pattern.permute.xlu0 %v852_v57 }
  0x21   :  { %194 = vperm.xlu0 %689, %v873_v2  }
  0x22   :  { %688 = vset.pattern.permute.xlu1 %v852_v57  ;;  %190 = vperm.xlu2 %687, %v877_v3  }
  0x23   :  { %186 = vperm.xlu1 %688, %v880_v4  }
  0x62   :  { %v903_v17 = vpop.permute.xlu2 %110 }
  0x6b   :  { %v929_v37 = vpop.permute.xlu2 %34 }
  0x6c   :  { %v69_v43 = vmul.f32 %v53_v7, %v929_v37  ;;  %v70_v44 = vmul.f32 %v54_v8, %v929_v37  ;;  %v71_v51 = vmul.f32 %v55_v9, %v929_v37  ;;  %v72_v60 = vmul.f32 %v892_v10, %v929_v37 }
  0x79   :  { %v894_v11 = vpop.permute.xlu0 %49 }
  0x7a   :  { %v896_v12 = vpop.permute.xlu1 %114  ;;  %v93_v13 = vmul.f32 %v53_v7, %v894_v11  ;;  %v94_v14 = vmul.f32 %v54_v8, %v894_v11  ;;  %v95_v15 = vmul.f32 %v55_v9, %v894_v11  ;;  %v96_v16 = vmul.f32 %v892_v10, %v894_v11 }
  0x7b   :  { %v97_v30 = vmul.f32 %v909_v22, %v894_v11  ;;  %v98_v35 = vmul.f32 %v911_v23, %v894_v11  ;;  %v99_v63 = vmul.f32 %v933_v42, %v894_v11  ;;  %v100_v6 = vmul.f32 %v946_v52, %v894_v11 }
  0x7c   :  { %v141_v18 = vadd.f32 %v896_v12, %v93_v13  ;;  %v142_v19 = vadd.f32 %v896_v12, %v94_v14  ;;  %v143_v20 = vadd.f32 %v896_v12, %v95_v15  ;;  %v144_v21 = vadd.f32 %v896_v12, %v96_v16 }
  0x7d   :  { %v145_v41 = vadd.f32 %v896_v12, %v97_v30  ;;  %v146_v45 = vadd.f32 %v896_v12, %v98_v35  ;;  %v147_v14 = vadd.f32 %v896_v12, %v99_v63  ;;  %v853_v30 = vmov 35  }
  0x7e   :  { %693 = vtanh.f32 %v141_v18  ;;  %v148_v18 = vadd.f32 %v896_v12, %v100_v6  ;;  %690 = vset.pattern.permute.xlu1 %v853_v30  ;;  %691 = vset.pattern.permute.xlu2 %v853_v30 }
  0x7f   :  { %695 = vtanh.f32 %v142_v19  ;;  %472 = vperm.xlu1 %690, %v884_v5   ;;  %476 = vperm.xlu2 %691, %v880_v4  }
  0x80   :  { %697 = vtanh.f32 %v143_v20 }
  0x81   :  { %v913_v24 = vpop.permute.xlu0 %44  ;;  %699 = vtanh.f32 %v144_v21 }
  0x82   :  { %v85_v26 = vmul.f32 %v53_v7, %v913_v24  ;;  %v86_v27 = vmul.f32 %v54_v8, %v913_v24  ;;  %v87_v28 = vmul.f32 %v55_v9, %v913_v24  ;;  %v88_v29 = vmul.f32 %v892_v10, %v913_v24 }
  0x83   :  { %v915_v25 = vpop.permute.xlu1 %39  ;;  %v90_v13 = vmul.f32 %v911_v23, %v913_v24  ;;  %v91_v15 = vmul.f32 %v933_v42, %v913_v24  ;;  %v92_v19 = vmul.f32 %v946_v52, %v913_v24 }
  0x84   :  { %v694_v31 = vpop.eup %693  ;;  %v133_v32 = vadd.f32 %v903_v17, %v85_v26  ;;  %v134_v33 = vadd.f32 %v903_v17, %v86_v27  ;;  %v135_v34 = vadd.f32 %v903_v17, %v87_v28  ;;  %v136_v38 = vadd.f32 %v903_v17, %v88_v29 }
  0x85   :  { %v696_v36 = vpop.eup %695  ;;  %218 = vmatpush.msra.mxu0 %v694_v31  ;;  %v77_v46 = vmul.f32 %v53_v7, %v915_v25  ;;  %v78_v47 = vmul.f32 %v54_v8, %v915_v25  ;;  %v79_v48 = vmul.f32 %v55_v9, %v915_v25  ;;  %v80_v50 = vmul.f32 %v892_v10, %v915_v25 }
  0x86   :  { %v698_v39 = vpop.eup %697  ;;  %247 = vmatpush.msra.mxu1 %v696_v36  ;;  %701 = vtanh.f32 %v133_v32  ;;  %v89_v9 = vmul.f32 %v909_v22, %v913_v24  ;;  %v138_v27 = vadd.f32 %v903_v17, %v90_v13  ;;  %v139_v29 = vadd.f32 %v903_v17, %v91_v15 }
  0x87   :  { %v700_v40 = vpop.eup %699  ;;  %276 = vmatpush.msra.mxu2 %v698_v39  ;;  %703 = vtanh.f32 %v134_v33  ;;  %v81_v12 = vmul.f32 %v909_v22, %v915_v25  ;;  %v140_v31 = vadd.f32 %v903_v17, %v92_v19  ;;  %v82_v32 = vmul.f32 %v911_v23, %v915_v25  ;;  %480 = vperm.xlu1 %690, %v877_v3  }
  0x88   :  { %305 = vmatpush.msra.mxu3 %v700_v40  ;;  %705 = vtanh.f32 %v135_v34  ;;  %v137_v21 = vadd.f32 %v903_v17, %v89_v9  ;;  %v83_v35 = vmul.f32 %v933_v42, %v915_v25  ;;  %v73_v36 = vmul.f32 %v909_v22, %v929_v37  ;;  %484 = vperm.xlu2 %691, %v873_v2  }
  0x89   :  { %707 = vtanh.f32 %v136_v38  ;;  %v84_v39 = vmul.f32 %v946_v52, %v915_v25  ;;  %v74_v40 = vmul.f32 %v911_v23, %v929_v37  ;;  %v76_v25 = vmul.f32 %v946_v52, %v929_v37 }
  0x8a   :  { %v941_v49 = vpop.permute.xlu0 %106  ;;  %709 = vtanh.f32 %v145_v41 }
  0x8b   :  { %v125_v54 = vadd.f32 %v941_v49, %v77_v46  ;;  %v126_v55 = vadd.f32 %v941_v49, %v78_v47  ;;  %v127_v56 = vadd.f32 %v941_v49, %v79_v48  ;;  %v128_v59 = vadd.f32 %v941_v49, %v80_v50 }
  0x8c   :  { %v948_v53 = vpop.permute.xlu1 %102  ;;  %v702_v58 = vpop.eup %701  ;;  %711 = vtanh.f32 %v146_v45  ;;  %v129_v34 = vadd.f32 %v941_v49, %v81_v12  ;;  %v130_v17 = vadd.f32 %v941_v49, %v82_v32  ;;  %v131_v22 = vadd.f32 %v941_v49, %v83_v35 }
  0x8d   :  { %v704_v61 = vpop.eup %703  ;;  %219 = vmatpush.msra.mxu0 %v702_v58  ;;  %713 = vtanh.f32 %v125_v54  ;;  %v117_v62 = vadd.f32 %v948_v53, %v69_v43  ;;  %v118_v1 = vadd.f32 %v948_v53, %v70_v44  ;;  %v119_v8 = vadd.f32 %v948_v53, %v71_v51 }
  0x8e   :  { %v706_v0 = vpop.eup %705  ;;  %248 = vmatpush.msra.mxu1 %v704_v61  ;;  %715 = vtanh.f32 %v126_v55  ;;  %v120_v10 = vadd.f32 %v948_v53, %v72_v60  ;;  %v75_v43 = vmul.f32 %v933_v42, %v929_v37  ;;  %v132_v23 = vadd.f32 %v941_v49, %v84_v39  ;;  %v470_v61 = vld [vmem:[#allocation2] sm:$0x1] }
  0x8f   :  { %v708_v7 = vpop.eup %707  ;;  %277 = vmatpush.msra.mxu2 %v706_v0  ;;  %717 = vtanh.f32 %v127_v56  ;;  %v121_v46 = vadd.f32 %v948_v53, %v73_v36  ;;  %v122_v47 = vadd.f32 %v948_v53, %v74_v40  ;;  %v124_v50 = vadd.f32 %v948_v53, %v76_v25 }
  0x90   :  { %306 = vmatpush.msra.mxu3 %v708_v7  ;;  %719 = vtanh.f32 %v128_v59  ;;  %v710_v11 = vpop.eup %709  ;;  %v123_v37 = vadd.f32 %v948_v53, %v75_v43 }
  0x91   :  { %721 = vtanh.f32 %v117_v62  ;;  %v854_v62 = vmov 36  }
  0x92   :  { %v712_v16 = vpop.eup %711  ;;  %723 = vtanh.f32 %v118_v1  ;;  %692 = vset.pattern.permute.xlu0 %v854_v62 }
  0x93   :  { %v714_v20 = vpop.eup %713  ;;  %725 = vtanh.f32 %v119_v8  ;;  %593 = vperm.xlu0 %692, %v470_v61  }
  0x94   :  { %v716_v26 = vpop.eup %715  ;;  %220 = vmatpush.msra.mxu0 %v714_v20  ;;  %727 = vtanh.f32 %v120_v10  ;;  %v1074_v10 = vpop.permute.xlu2 %182 }
  0x95   :  { %v718_v28 = vpop.eup %717  ;;  %249 = vmatpush.msra.mxu1 %v716_v26  ;;  %729 = vtanh.f32 %v147_v14 }
  0x96   :  { %v720_v24 = vpop.eup %719  ;;  %278 = vmatpush.msra.mxu2 %v718_v28  ;;  %731 = vtanh.f32 %v148_v18  ;;  %v1077_v18 = vpop.permute.xlu1 %186 }
  0x97   :  { %v722_v33 = vpop.eup %721  ;;  %307 = vmatpush.msra.mxu3 %v720_v24  ;;  %733 = vtanh.f32 %v137_v21 }
  0x98   :  { %v724_v38 = vpop.eup %723  ;;  %221 = vmatpush.msra.mxu0 %v722_v33  ;;  %735 = vtanh.f32 %v138_v27  ;;  %v1089_v33 = vpop.permute.xlu0 %194 }
  0x99   :  { %v726_v41 = vpop.eup %725  ;;  %250 = vmatpush.msra.mxu1 %v724_v38  ;;  %640 = vmatmul.msk.f32.vlgmr.msra.gmra.mxu0 %vm197_vm0, %v884_v5  ;;  %737 = vtanh.f32 %v139_v29 }
  0x9a   :  { %v728_v44 = vpop.eup %727  ;;  %279 = vmatpush.msra.mxu2 %v726_v41  ;;  %644 = vmatmul.msk.f32.vlgmr.msra.gmra.mxu1 %vm197_vm0, %v884_v5  ;;  %739 = vtanh.f32 %v140_v31 }
  0x9b   :  { %v730_v45 = vpop.eup %729  ;;  %308 = vmatpush.msra.mxu3 %v728_v44  ;;  %648 = vmatmul.msk.f32.vlgmr.msra.gmra.mxu2 %vm197_vm0, %v884_v5  ;;  %741 = vtanh.f32 %v129_v34 }
  0x9c   :  { %v732_v42 = vpop.eup %731  ;;  %652 = vmatmul.msk.f32.vlgmr.msra.gmra.mxu3 %vm197_vm0, %v884_v5  ;;  %334 = vmatpush.msrb.mxu0 %v710_v11  ;;  %743 = vtanh.f32 %v130_v17  ;;  %v1081_v20 = vpop.permute.xlu2 %190 }
  0x9d   :  { %v734_v48 = vpop.eup %733  ;;  %363 = vmatpush.msrb.mxu1 %v712_v16  ;;  %392 = vmatpush.msrb.mxu2 %v730_v45  ;;  %745 = vtanh.f32 %v131_v22 }
  0x9e   :  { %v736_v49 = vpop.eup %735  ;;  %421 = vmatpush.msrb.mxu3 %v732_v42  ;;  %335 = vmatpush.msrb.mxu0 %v734_v48  ;;  %747 = vtanh.f32 %v132_v23 }
  0x9f   :  { %v738_v51 = vpop.eup %737  ;;  %364 = vmatpush.msrb.mxu1 %v736_v49  ;;  %749 = vtanh.f32 %v121_v46 }
  0xa0   :  { %v740_v52 = vpop.eup %739  ;;  %393 = vmatpush.msrb.mxu2 %v738_v51  ;;  %751 = vtanh.f32 %v122_v47 }
  0xa1   :  { %v742_v54 = vpop.eup %741  ;;  %422 = vmatpush.msrb.mxu3 %v740_v52  ;;  %753 = vtanh.f32 %v123_v37  ;;  %641 = vmatmul.msk.f32.gmra.mxu0 %vm197_vm0, %v880_v4 }
  0xa2   :  { %v744_v55 = vpop.eup %743  ;;  %336 = vmatpush.msrb.mxu0 %v742_v54  ;;  %755 = vtanh.f32 %v124_v50  ;;  %645 = vmatmul.msk.f32.gmra.mxu1 %vm197_vm0, %v880_v4 }
  0xa3   :  { %v746_v53 = vpop.eup %745  ;;  %365 = vmatpush.msrb.mxu1 %v744_v55  ;;  %649 = vmatmul.msk.f32.gmra.mxu2 %vm197_vm0, %v880_v4 }
  0xa4   :  { %v748_v56 = vpop.eup %747  ;;  %394 = vmatpush.msrb.mxu2 %v746_v53  ;;  %653 = vmatmul.msk.f32.gmra.mxu3 %vm197_vm0, %v880_v4 }
  0xa5   :  { %v750_v57 = vpop.eup %749  ;;  %423 = vmatpush.msrb.mxu3 %v748_v56 }
  0xa6   :  { %v752_v58 = vpop.eup %751  ;;  %337 = vmatpush.msrb.mxu0 %v750_v57 }
  0xa7   :  { %v754_v59 = vpop.eup %753  ;;  %366 = vmatpush.msrb.mxu1 %v752_v58 }
  0xa8   :  { %v756_v60 = vpop.eup %755  ;;  %395 = vmatpush.msrb.mxu2 %v754_v59 }
  0xa9   :  { %424 = vmatpush.msrb.mxu3 %v756_v60  ;;  %642 = vmatmul.msk.f32.gmra.mxu0 %vm197_vm0, %v877_v3 }
  0xaa   :  { %646 = vmatmul.msk.f32.gmra.mxu1 %vm197_vm0, %v877_v3 }
  0xab   :  { %650 = vmatmul.msk.f32.gmra.mxu2 %vm197_vm0, %v877_v3 }
  0xac   :  { %654 = vmatmul.msk.f32.gmra.mxu3 %vm197_vm0, %v877_v3 }
  0xb1   :  { %643 = vmatmul.msk.f32.gmra.mxu0 %vm197_vm0, %v873_v2 }
  0xb2   :  { %647 = vmatmul.msk.f32.gmra.mxu1 %vm197_vm0, %v873_v2 }
  0xb3   :  { %651 = vmatmul.msk.f32.gmra.mxu2 %vm197_vm0, %v873_v2 }
  0xb4   :  { %655 = vmatmul.msk.f32.gmra.mxu3 %vm197_vm0, %v873_v2 }
  0xb9   :  { %656 = vmatmul.msk.f32.vlgmr.msrb.gmra.mxu0 %vm197_vm0, %v884_v5 }
  0xba   :  { %660 = vmatmul.msk.f32.vlgmr.msrb.gmra.mxu1 %vm197_vm0, %v884_v5 }
  0xbb   :  { %664 = vmatmul.msk.f32.vlgmr.msrb.gmra.mxu2 %vm197_vm0, %v884_v5 }
  0xbc   :  { %668 = vmatmul.msk.f32.vlgmr.msrb.gmra.mxu3 %vm197_vm0, %v884_v5 }
  0xc1   :  { %657 = vmatmul.msk.f32.gmra.mxu0 %vm197_vm0, %v880_v4 }
  0xc2   :  { %661 = vmatmul.msk.f32.gmra.mxu1 %vm197_vm0, %v880_v4 }
  0xc3   :  { %665 = vmatmul.msk.f32.gmra.mxu2 %vm197_vm0, %v880_v4 }
  0xc4   :  { %669 = vmatmul.msk.f32.gmra.mxu3 %vm197_vm0, %v880_v4 }
  0xc9   :  { %658 = vmatmul.msk.f32.gmra.mxu0 %vm197_vm0, %v877_v3 }
  0xca   :  { %662 = vmatmul.msk.f32.gmra.mxu1 %vm197_vm0, %v877_v3 }
  0xcb   :  { %666 = vmatmul.msk.f32.gmra.mxu2 %vm197_vm0, %v877_v3 }
  0xcc   :  { %670 = vmatmul.msk.f32.gmra.mxu3 %vm197_vm0, %v877_v3 }
  0xd1   :  { %659 = vmatmul.msk.f32.gmra.mxu0 %vm197_vm0, %v873_v2 }
  0xd2   :  { %663 = vmatmul.msk.f32.gmra.mxu1 %vm197_vm0, %v873_v2 }
  0xd3   :  { %667 = vmatmul.msk.f32.gmra.mxu2 %vm197_vm0, %v873_v2 }
  0xd4   :  { %671 = vmatmul.msk.f32.gmra.mxu3 %vm197_vm0, %v873_v2 }
  0xd9   :  { %v1097_v45 = vpop.permute.xlu2 %476 }
  0xf1   :  { %v1092_v36 = vpop.permute.xlu1 %472 }
  0xf9   :  { %v1107_v57 = vpop.permute.xlu1 %480 }
 0x116   :  { %v223_v4 = vpop.f32.mrf.mxu0 }
 0x117   :  { %v252_v5 = vpop.f32.mrf.mxu1  ;;  %v224_v43 = vadd.f32 %v223_v4, %v1074_v10 }
 0x118   :  { %v253_v16 = vadd.f32 %v252_v5, %v1074_v10 }
 0x11a   :  { %757 = vtanh.f32 %v253_v16 }
 0x11e   :  { %v281_v63 = vpop.f32.mrf.mxu2  ;;  %v226_v0 = vpop.f32.mrf.mxu0 }
 0x11f   :  { %v310_v1 = vpop.f32.mrf.mxu3  ;;  %v255_v6 = vpop.f32.mrf.mxu1  ;;  %v282_v2 = vadd.f32 %v281_v63, %v1074_v10  ;;  %v227_v21 = vadd.f32 %v226_v0, %v1077_v18 }
 0x120   :  { %v311_v19 = vadd.f32 %v310_v1, %v1074_v10  ;;  %v256_v30 = vadd.f32 %v255_v6, %v1077_v18  ;;  %v758_v35 = vpop.eup %757 }
 0x121   :  { %759 = vtanh.f32 %v282_v2  ;;  %v488_v53 = vmul.f32 %v758_v35, %v1092_v36 }
 0x122   :  { %761 = vtanh.f32 %v311_v19 }
 0x123   :  { %763 = vtanh.f32 %v227_v21 }
 0x126   :  { %v284_v7 = vpop.f32.mrf.mxu2  ;;  %v229_v3 = vpop.f32.mrf.mxu0 }
 0x127   :  { %v313_v8 = vpop.f32.mrf.mxu3  ;;  %v258_v9 = vpop.f32.mrf.mxu1  ;;  %v285_v28 = vadd.f32 %v284_v7, %v1077_v18  ;;  %v230_v47 = vadd.f32 %v229_v3, %v1081_v20 }
 0x128   :  { %v314_v24 = vadd.f32 %v313_v8, %v1077_v18  ;;  %v259_v38 = vadd.f32 %v258_v9, %v1081_v20  ;;  %v760_v17 = vpop.eup %759 }
 0x129   :  { %765 = vtanh.f32 %v285_v28  ;;  %v762_v22 = vpop.eup %761  ;;  %v489_v56 = vmul.f32 %v760_v17, %v1092_v36 }
 0x12a   :  { %767 = vtanh.f32 %v256_v30  ;;  %v764_v25 = vpop.eup %763  ;;  %v490_v60 = vmul.f32 %v762_v22, %v1092_v36 }
 0x12b   :  { %769 = vtanh.f32 %v314_v24  ;;  %v495_v0 = vmul.f32 %v764_v25, %v1097_v45 }
 0x12e   :  { %v287_v13 = vpop.f32.mrf.mxu2  ;;  %v232_v11 = vpop.f32.mrf.mxu0 }
 0x12f   :  { %v316_v14 = vpop.f32.mrf.mxu3  ;;  %v261_v15 = vpop.f32.mrf.mxu1  ;;  %v288_v31 = vadd.f32 %v287_v13, %v1081_v20  ;;  %v233_v37 = vadd.f32 %v232_v11, %v1089_v33 }
 0x130   :  { %v317_v32 = vadd.f32 %v316_v14, %v1081_v20  ;;  %v262_v46 = vadd.f32 %v261_v15, %v1089_v33  ;;  %v766_v42 = vpop.eup %765  ;;  %v1117_v11 = vpop.permute.xlu2 %484 }
 0x131   :  { %771 = vtanh.f32 %v288_v31  ;;  %v768_v48 = vpop.eup %767  ;;  %v497_v52 = vmul.f32 %v766_v42, %v1097_v45 }
 0x132   :  { %773 = vtanh.f32 %v317_v32  ;;  %v770_v49 = vpop.eup %769  ;;  %v496_v9 = vmul.f32 %v768_v48, %v1097_v45 }
 0x133   :  { %v498_v61 = vmul.f32 %v770_v49, %v1097_v45  ;;  %v537_v13 = vadd.f32 %v497_v52, %v489_v56 }
 0x134   :  { %v528_v32 = vadd.f32 %v496_v9, %v488_v53 }
 0x136   :  { %v290_v26 = vpop.f32.mrf.mxu2  ;;  %v339_v27 = vpop.f32.mrf.mxu0 }
 0x137   :  { %v319_v29 = vpop.f32.mrf.mxu3  ;;  %v368_v12 = vpop.f32.mrf.mxu1  ;;  %v291_v34 = vadd.f32 %v290_v26, %v1089_v33  ;;  %v340_v50 = vadd.f32 %v339_v27, %v1074_v10  ;;  %v546_v26 = vadd.f32 %v498_v61, %v490_v60 }
 0x138   :  { %v320_v39 = vadd.f32 %v319_v29, %v1089_v33  ;;  %v772_v51 = vpop.eup %771  ;;  %v369_v54 = vadd.f32 %v368_v12, %v1074_v10 }
 0x139   :  { %775 = vtanh.f32 %v291_v34  ;;  %v774_v55 = vpop.eup %773  ;;  %v505_v1 = vmul.f32 %v772_v51, %v1107_v57 }
 0x13a   :  { %777 = vtanh.f32 %v259_v38  ;;  %v506_v15 = vmul.f32 %v774_v55, %v1107_v57 }
 0x13b   :  { %779 = vtanh.f32 %v320_v39  ;;  %v538_v29 = vadd.f32 %v537_v13, %v505_v1 }
 0x13c   :  { %781 = vtanh.f32 %v224_v43  ;;  %v547_v38 = vadd.f32 %v546_v26, %v506_v15 }
 0x13d   :  { %783 = vtanh.f32 %v262_v46 }
 0x13e   :  { %v397_v40 = vpop.f32.mrf.mxu2  ;;  %v342_v41 = vpop.f32.mrf.mxu0  ;;  %785 = vtanh.f32 %v230_v47 }
 0x13f   :  { %v426_v44 = vpop.f32.mrf.mxu3  ;;  %v371_v23 = vpop.f32.mrf.mxu1  ;;  %v398_v58 = vadd.f32 %v397_v40, %v1074_v10  ;;  %787 = vtanh.f32 %v233_v37  ;;  %v343_v6 = vadd.f32 %v342_v41, %v1077_v18 }
 0x140   :  { %v776_v59 = vpop.eup %775  ;;  %v427_v62 = vadd.f32 %v426_v44, %v1074_v10  ;;  %789 = vtanh.f32 %v340_v50  ;;  %v372_v10 = vadd.f32 %v371_v23, %v1077_v18 }
 0x141   :  { %v778_v63 = vpop.eup %777  ;;  %791 = vtanh.f32 %v369_v54  ;;  %v513_v16 = vmul.f32 %v776_v59, %v1117_v11 }
 0x142   :  { %v780_v8 = vpop.eup %779  ;;  %793 = vtanh.f32 %v398_v58  ;;  %v504_v21 = vmul.f32 %v778_v63, %v1107_v57 }
 0x143   :  { %v782_v14 = vpop.eup %781  ;;  %795 = vtanh.f32 %v427_v62  ;;  %v514_v12 = vmul.f32 %v780_v8, %v1117_v11  ;;  %v539_v39 = vadd.f32 %v538_v29, %v513_v16 }
 0x144   :  { %v784_v19 = vpop.eup %783  ;;  %797 = vtanh.f32 %v343_v6  ;;  %v487_v31 = vmul.f32 %v782_v14, %v1092_v36  ;;  %v529_v43 = vadd.f32 %v528_v32, %v504_v21 }
 0x145   :  { %v786_v28 = vpop.eup %785  ;;  %799 = vtanh.f32 %v372_v10  ;;  %v512_v17 = vmul.f32 %v784_v19, %v1117_v11  ;;  %v548_v46 = vadd.f32 %v547_v38, %v514_v12  ;;  %v540_v55 = vrot.slane %v539_v39, 4 }
 0x146   :  { %v400_v4 = vpop.f32.mrf.mxu2  ;;  %v345_v5 = vpop.f32.mrf.mxu0  ;;  %v503_v41 = vmul.f32 %v786_v28, %v1107_v57  ;;  %v519_v22 = vadd.f32 %v495_v0, %v487_v31 }
 0x147   :  { %v429_v7 = vpop.f32.mrf.mxu3  ;;  %v374_v3 = vpop.f32.mrf.mxu1  ;;  %v346_v2 = vadd.f32 %v345_v5, %v1081_v20  ;;  %v401_v30 = vadd.f32 %v400_v4, %v1077_v18  ;;  %v530_v54 = vadd.f32 %v529_v43, %v512_v17  ;;  %v549_v59 = vrot.slane %v548_v46, 4 }
 0x148   :  { %v375_v27 = vadd.f32 %v374_v3, %v1081_v20  ;;  %v788_v24 = vpop.eup %787  ;;  %v430_v34 = vadd.f32 %v429_v7, %v1077_v18  ;;  %v520_v56 = vadd.f32 %v519_v22, %v503_v41 }
 0x149   :  { %v790_v35 = vpop.eup %789  ;;  %801 = vtanh.f32 %v346_v2  ;;  %v511_v49 = vmul.f32 %v788_v24, %v1117_v11  ;;  %v531_v5 = vrot.slane %v530_v54, 4  ;;  %v550_v9 = vadd.f32 %v549_v59, %v548_v46 }
 0x14a   :  { %v792_v40 = vpop.eup %791  ;;  %803 = vtanh.f32 %v375_v27  ;;  %v491_v1 = vmul.f32 %v790_v35, %v1092_v36 }
 0x14b   :  { %v794_v25 = vpop.eup %793  ;;  %805 = vtanh.f32 %v401_v30  ;;  %v521_v61 = vadd.f32 %v520_v56, %v511_v49  ;;  %v492_v8 = vmul.f32 %v792_v40, %v1092_v36  ;;  %v532_v26 = vadd.f32 %v531_v5, %v530_v54 }
 0x14c   :  { %v796_v37 = vpop.eup %795  ;;  %807 = vtanh.f32 %v430_v34  ;;  %v551_v34 = vrot.slane %v550_v9, 2 }
 0x14d   :  { %v798_v52 = vpop.eup %797  ;;  %v522_v16 = vrot.slane %v521_v61, 4  ;;  %v533_v40 = vrot.slane %v532_v26, 2 }
 0x14e   :  { %v403_v44 = vpop.f32.mrf.mxu2  ;;  %v348_v23 = vpop.f32.mrf.mxu0  ;;  %v499_v62 = vmul.f32 %v798_v52, %v1097_v45 }
 0x14f   :  { %v404_v42 = vadd.f32 %v403_v44, %v1081_v20  ;;  %v432_v18 = vpop.f32.mrf.mxu3  ;;  %v349_v47 = vadd.f32 %v348_v23, %v1089_v33  ;;  %v377_v48 = vpop.f32.mrf.mxu1  ;;  %v523_v43 = vadd.f32 %v522_v16, %v521_v61 }
 0x150   :  { %v433_v50 = vadd.f32 %v432_v18, %v1081_v20  ;;  %v378_v51 = vadd.f32 %v377_v48, %v1089_v33  ;;  %v800_v53 = vpop.eup %799  ;;  %v541_v20 = vadd.f32 %v540_v55, %v539_v39  ;;  %v555_v2 = vadd.f32 %v499_v62, %v491_v1 }
 0x151   :  { %809 = vtanh.f32 %v404_v42  ;;  %v802_v58 = vpop.eup %801  ;;  %v500_v63 = vmul.f32 %v800_v53, %v1097_v45  ;;  %v494_v39 = vmul.f32 %v796_v37, %v1092_v36  ;;  %v552_v18 = vadd.f32 %v551_v34, %v550_v9 }
 0x152   :  { %811 = vtanh.f32 %v433_v50  ;;  %v804_v60 = vpop.eup %803  ;;  %v507_v6 = vmul.f32 %v802_v58, %v1107_v57  ;;  %v542_v28 = vrot.slane %v541_v20, 2 }
 0x153   :  { %813 = vtanh.f32 %v349_v47  ;;  %v806_v4 = vpop.eup %805  ;;  %v508_v13 = vmul.f32 %v804_v60, %v1107_v57  ;;  %v564_v27 = vadd.f32 %v500_v63, %v492_v8  ;;  %v553_v56 = vrot.slane %v552_v18, 1 }
 0x154   :  { %815 = vtanh.f32 %v378_v51  ;;  %v808_v0 = vpop.eup %807  ;;  %v501_v12 = vmul.f32 %v806_v4, %v1097_v45  ;;  %v556_v30 = vadd.f32 %v555_v2, %v507_v6  ;;  %v543_v42 = vadd.f32 %v542_v28, %v541_v20 }
 0x155   :  { %v502_v31 = vmul.f32 %v808_v0, %v1097_v45  ;;  %v565_v32 = vadd.f32 %v564_v27, %v508_v13  ;;  %v534_v51 = vadd.f32 %v533_v40, %v532_v26  ;;  %v554_v6 = vadd.f32 %v553_v56, %v552_v18 }
 0x156   :  { %v406_v7 = vpop.f32.mrf.mxu2  ;;  %v544_v53 = vrot.slane %v543_v42, 1 }
 0x157   :  { %v810_v3 = vpop.eup %809  ;;  %v407_v10 = vadd.f32 %v406_v7, %v1089_v33  ;;  %v435_v14 = vpop.f32.mrf.mxu3  ;;  %v582_v45 = vadd.f32 %v502_v31, %v494_v39  ;;  %v535_v62 = vrot.slane %v534_v51, 1 }
 0x158   :  { %v812_v15 = vpop.eup %811  ;;  %v436_v19 = vadd.f32 %v435_v14, %v1089_v33  ;;  %v493_v33 = vmul.f32 %v794_v25, %v1092_v36  ;;  %v509_v38 = vmul.f32 %v810_v3, %v1107_v57  ;;  %v545_v1 = vadd.f32 %v544_v53, %v543_v42  ;;  %v594_v14 = vpop.permute.xlu0 %593 }
 0x159   :  { %v814_v21 = vpop.eup %813  ;;  %817 = vtanh.f32 %v407_v10  ;;  %v510_v41 = vmul.f32 %v812_v15, %v1107_v57  ;;  %v524_v57 = vrot.slane %v523_v43, 2  ;;  %v536_v8 = vadd.f32 %v535_v62, %v534_v51 }
 0x15a   :  { %v816_v29 = vpop.eup %815  ;;  %v515_v24 = vmul.f32 %v814_v21, %v1117_v11  ;;  %819 = vtanh.f32 %v436_v19  ;;  %v573_v44 = vadd.f32 %v501_v12, %v493_v33  ;;  %v598_v2 = vadd.f32 %v594_v14, %v545_v1 }
 0x15b   :  { %v516_v35 = vmul.f32 %v816_v29, %v1117_v11  ;;  %v583_v52 = vadd.f32 %v582_v45, %v510_v41  ;;  %v525_v20 = vadd.f32 %v524_v57, %v523_v43  ;;  %v599_v19 = vadd.f32 %v594_v14, %v554_v6 }
 0x15c   :  { %v557_v17 = vadd.f32 %v556_v30, %v515_v24  ;;  %v574_v49 = vadd.f32 %v573_v44, %v509_v38  ;;  %v597_v27 = vadd.f32 %v594_v14, %v536_v8  ;;  %v613_v31 = vrot.slane %v598_v2, 6 }
 0x15d   :  { %v566_v22 = vadd.f32 %v565_v32, %v516_v35  ;;  %v526_v16 = vrot.slane %v525_v20, 1  ;;  %v614_v32 = vrot.slane %v599_v19, 5 }
 0x15e   :  { %v558_v23 = vrot.slane %v557_v17, 4  ;;  %v612_v33 = vrot.slane %v597_v27, 7 }
 0x15f   :  { %v818_v46 = vpop.eup %817  ;;  %v567_v47 = vrot.slane %v566_v22, 4  ;;  %v527_v24 = vadd.f32 %v526_v16, %v525_v20 }
 0x160   :  { %v820_v48 = vpop.eup %819  ;;  %v559_v25 = vadd.f32 %v558_v23, %v557_v17  ;;  %v517_v50 = vmul.f32 %v818_v46, %v1117_v11 }
 0x161   :  { %v568_v36 = vadd.f32 %v567_v47, %v566_v22  ;;  %v518_v37 = vmul.f32 %v820_v48, %v1117_v11  ;;  %v596_v41 = vadd.f32 %v594_v14, %v527_v24  ;;  %v622_v22 = vsel %vm621_vm2, %v613_v31, %v614_v32 }
 0x162   :  { %v560_v54 = vrot.slane %v559_v25, 2  ;;  %v575_v55 = vadd.f32 %v574_v49, %v517_v50 }
 0x163   :  { %v569_v58 = vrot.slane %v568_v36, 2  ;;  %v584_v59 = vadd.f32 %v583_v52, %v518_v37  ;;  %v620_v44 = vsel %vm619_vm1, %v596_v41, %v612_v33 }
 0x164   :  { %v561_v60 = vadd.f32 %v560_v54, %v559_v25  ;;  %v576_v61 = vrot.slane %v575_v55, 4  ;;  %v624_v45 = vsel %vm623_vm3, %v620_v44, %v622_v22 }
 0x165   :  { %v570_v4 = vadd.f32 %v569_v58, %v568_v36  ;;  %v585_v5 = vrot.slane %v584_v59, 4 }
 0x166   :  { %v562_v63 = vrot.slane %v561_v60, 1  ;;  %v577_v0 = vadd.f32 %v576_v61, %v575_v55 }
 0x167   :  { %v571_v7 = vrot.slane %v570_v4, 1  ;;  %v586_v3 = vadd.f32 %v585_v5, %v584_v59 }
 0x168   :  { %v578_v11 = vrot.slane %v577_v0, 2  ;;  %v563_v9 = vadd.f32 %v562_v63, %v561_v60 }
 0x169   :  { %v572_v13 = vadd.f32 %v571_v7, %v570_v4  ;;  %v587_v10 = vrot.slane %v586_v3, 2 }
 0x16a   :  { %v579_v15 = vadd.f32 %v578_v11, %v577_v0  ;;  %v600_v28 = vadd.f32 %v594_v14, %v563_v9 }
 0x16b   :  { %v588_v21 = vadd.f32 %v587_v10, %v586_v3  ;;  %v601_v29 = vadd.f32 %v594_v14, %v572_v13 }
 0x16c   :  { %v580_v26 = vrot.slane %v579_v15, 1  ;;  %v615_v38 = vrot.slane %v600_v28, 4 }
 0x16d   :  { %v589_v12 = vrot.slane %v588_v21, 1  ;;  %v616_v17 = vrot.slane %v601_v29, 3 }
 0x16e   :  { %v581_v30 = vadd.f32 %v580_v26, %v579_v15 }
 0x16f   :  { %v590_v34 = vadd.f32 %v589_v12, %v588_v21  ;;  %v626_v23 = vsel %vm625_vm4, %v615_v38, %v616_v17 }
 0x170   :  { %v602_v35 = vadd.f32 %v594_v14, %v581_v30 }
 0x171   :  { %v603_v39 = vadd.f32 %v594_v14, %v590_v34 }
 0x172   :  { %v617_v40 = vrot.slane %v602_v35, 2 }
 0x173   :  { %v618_v43 = vrot.slane %v603_v39, 1 }
 0x175   :  { %v628_v46 = vsel %vm627_vm5, %v617_v40, %v618_v43 }
 0x176   :  { %v630_v42 = vsel %vm629_vm6, %v626_v23, %v628_v46 }
 0x177   :  { %v632_v18 = vsel %vm631_vm7, %v624_v45, %v630_v42 }
 0x178   :  { %634 = vst [vmem:[%s1160_s2] sm:$0xff] %v632_v18 }
 0x179   :  { %639 = vsyncpa [#allocation3], 1 }

</bundles_post_ra>
